<compile_context>
chip_gen: v5e
topology: v5e:2x2
jax: 0.10.0
libtpu: 0.0.40
codegen_flags: <defaults>
</compile_context>

<pallas_src>
import jax
import jax.numpy as jnp
from jax.experimental import pallas as pl
from jax.experimental.pallas import tpu as pltpu

PAD = 128  # lane width: pad every *hidden* feature dim to this


def _round_up(x, m):
    return ((x + m - 1) // m) * m


def hypertuning_kernel(x_ref, w1_ref, b1_ref, w2_ref, b2_ref, w3_ref, b3_ref,
                       out_ref):
    # Layer 0: Linear + ReLU (+ dropout p=0.5 -> identity in eval mode).
    # bf16 MXU inputs, f32 accumulation; bias add / relu in f32.
    x = x_ref[...].astype(jnp.bfloat16)
    h = jnp.dot(x, w1_ref[...], preferred_element_type=jnp.float32) + b1_ref[...]
    h = jnp.maximum(h, 0.0).astype(jnp.bfloat16)

    # Layer 1: Linear + tanh (+ dropout p=0 -> identity).
    h = jnp.dot(h, w2_ref[...], preferred_element_type=jnp.float32) + b2_ref[...]
    h = jnp.tanh(h.astype(jnp.bfloat16))          # bf16 EUP path on v6e/v7x

    # Final layer: Linear + softmax over dim=1.  w3/b3 keep the real fan_out,
    # so logits has only the n_out real lanes -> no masking trick needed and
    # the store is an n_out-wide f32 block (8x less output DMA than 128-pad).
    logits = jnp.dot(h, w3_ref[...], preferred_element_type=jnp.float32) + b3_ref[...]
    m = jnp.max(logits, axis=1, keepdims=True)
    e = jnp.exp(logits - m)
    denom = jnp.sum(e, axis=1, keepdims=True)
    out_ref[...] = (e / denom).astype(out_ref.dtype)   # exact normalization


def prepare_params(params):
    """Pad raw (W_t (in,out) f32, b (1,out) f32) params for the kernel.

    Hidden dims are zero-padded to 128 lanes; the first layer's fan_in and the
    last layer's fan_out stay at their real sizes.  Weights are cast to bf16
    once (MXU fast path); biases stay f32 (added to the f32 accumulator).
    Zero padding is exact: padded hidden units are relu(0)=0 / tanh(0)=0 and
    contribute nothing downstream.
    """
    prepped = []
    n_layers = len(params)
    for li, (w, b) in enumerate(params):
        fan_in, fan_out = w.shape
        in_p = fan_in if li == 0 else PAD
        out_p = fan_out if li == n_layers - 1 else PAD
        w_p = jnp.zeros((in_p, out_p), jnp.float32).at[:fan_in, :fan_out].set(w)
        b_p = jnp.zeros((1, out_p), jnp.float32).at[:, :fan_out].set(b)
        prepped.append((w_p.astype(jnp.bfloat16), b_p))
    return prepped


def hypertuning_forward(x, prepped_params, *, max_tb=1024):
    """x: (B, neurons[0]) f32 (or bf16). Returns (B, n_out) f32 softmax probs."""
    (w1, b1), (w2, b2), (w3, b3) = prepped_params
    B, n_in = x.shape
    n_out = w3.shape[1]

    # Batch tile: multiple of 8 sublanes.  At least 2 grid steps whenever the
    # batch allows it so ("parallel",) can shard across v7x's 2 TensorCores;
    # tile capped at max_tb rows (VMEM footprint at TB=1024 is ~1-3 MiB of
    # double-buffered blocks + ~100 KiB of weights, tiny on every generation).
    B8 = _round_up(B, 8)
    n_steps = max(2, pl.cdiv(B8, max_tb)) if B8 > 8 else 1
    TB = min(_round_up(pl.cdiv(B8, n_steps), 8), B8)
    Bp = _round_up(B, TB)
    if Bp != B:                    # at most a few TB-rounding rows of padding
        x = jnp.pad(x, ((0, Bp - B), (0, 0)))
    grid = (Bp // TB,)

    weight_bytes = sum(int(a.size) * a.dtype.itemsize
                       for a in (w1, b1, w2, b2, w3, b3))
    cost = pl.CostEstimate(
        flops=2 * Bp * (n_in * PAD + PAD * PAD + PAD * n_out),
        transcendentals=Bp * (PAD + n_out),          # tanh + exp
        bytes_accessed=(Bp * n_in * x.dtype.itemsize
                        + Bp * n_out * 4 + weight_bytes),
    )

    out = pl.pallas_call(
        hypertuning_kernel,
        out_shape=jax.ShapeDtypeStruct((Bp, n_out), jnp.float32),
        grid=grid,
        in_specs=[
            pl.BlockSpec((TB, n_in), lambda i: (i, 0)),     # x: tiled over batch
            pl.BlockSpec((n_in, PAD), lambda i: (0, 0)),    # weights/biases stay
            pl.BlockSpec((1, PAD), lambda i: (0, 0)),       #   VMEM-resident
            pl.BlockSpec((PAD, PAD), lambda i: (0, 0)),
            pl.BlockSpec((1, PAD), lambda i: (0, 0)),
            pl.BlockSpec((PAD, n_out), lambda i: (0, 0)),   # last dims == full dims
            pl.BlockSpec((1, n_out), lambda i: (0, 0)),
        ],
        out_specs=pl.BlockSpec((TB, n_out), lambda i: (i, 0)),  # slim writeback
        compiler_params=pltpu.CompilerParams(
            dimension_semantics=("parallel",),          # megacore batch split
            vmem_limit_bytes=32 * 1024 * 1024,          # headroom if max_tb raised
        ),
        cost_estimate=cost,
    )(x, w1, b1, w2, b2, w3, b3)

    return out if Bp == B else out[:B]


def init_params(key, neurons):
    """Deterministic init mimicking nn.Linear's uniform(-1/sqrt(fan_in), +)."""
    params = []
    for i in range(len(neurons) - 1):
        fan_in, fan_out = neurons[i], neurons[i + 1]
        key, kw, kb = jax.random.split(key, 3)
        bound = 1.0 / jnp.sqrt(fan_in)
        # PyTorch stores W as (out, in); pre-transposed to (in, out) here.
        w_t = jax.random.uniform(kw, (fan_in, fan_out), jnp.float32, -bound, bound)
        b = jax.random.uniform(kb, (1, fan_out), jnp.float32, -bound, bound)
        params.append((w_t, b))
    return params


def reference_forward(x, params):
    """Pure-JAX f32 reference matching the PyTorch module in eval mode."""
    (w1, b1), (w2, b2), (w3, b3) = params
    h = jnp.maximum(x @ w1 + b1, 0.0)
    h = jnp.tanh(h @ w2 + b2)
    logits = h @ w3 + b3
    return jax.nn.softmax(logits, axis=1)


if __name__ == "__main__":
    # Module config: neurons=[32,64,48,16], activations=[relu,tanh],
    # dropouts=[True,False], dropout_prob=0.5 (identity in eval mode).
    neurons = [32, 64, 48, 16]
    B = 64

    key = jax.random.PRNGKey(0)
    key, kx = jax.random.split(key)
    x = jax.random.normal(kx, (B, neurons[0]), dtype=jnp.float32)
    params = init_params(key, neurons)
    prepped = prepare_params(params)

    out = hypertuning_forward(x, prepped)
    out = jax.block_until_ready(out)

    ref = reference_forward(x, params)
    assert out.shape == (B, neurons[-1])
    # bf16 matmul inputs / bf16 tanh (f32 accumulation) -> loosened tolerance.
    assert jnp.allclose(out, ref, atol=2e-2, rtol=2e-2), "mismatch vs reference"
    # Exact in-kernel normalization -> rows sum to 1 up to f32 rounding.
    assert jnp.allclose(jnp.sum(out, axis=1), 1.0, atol=1e-3), \
        "softmax rows must sum to 1"

    print("KERNEL_OK")
</pallas_src>

<mosaic_0001>
module attributes {stable_mosaic.version = 11 : i64} {
  func.func @hypertuning_kernel(%arg0: i32, %arg1: memref<32x32xf32, #tpu.memory_space<vmem>>, %arg2: memref<32x128xbf16, #tpu.memory_space<vmem>>, %arg3: memref<1x128xf32, #tpu.memory_space<vmem>>, %arg4: memref<128x128xbf16, #tpu.memory_space<vmem>>, %arg5: memref<1x128xf32, #tpu.memory_space<vmem>>, %arg6: memref<128x16xbf16, #tpu.memory_space<vmem>>, %arg7: memref<1x16xf32, #tpu.memory_space<vmem>>, %arg8: memref<32x16xf32, #tpu.memory_space<vmem>>) attributes {dimension_semantics = [#tpu.dimension_semantics<parallel>], iteration_bounds = array<i64: 2>, scalar_prefetch = 0 : i64, scratch_operands = 0 : i64, tpu.core_type = #tpu.core_type<tc>, window_params = [{transform_indices = @transform_0, window_bounds = array<i64: 32, 32>}, {pipeline_mode = #tpu.pipeline_mode<synchronous>, transform_indices = @transform_1, window_bounds = array<i64: 32, 128>}, {pipeline_mode = #tpu.pipeline_mode<synchronous>, transform_indices = @transform_2, window_bounds = array<i64: 1, 128>}, {pipeline_mode = #tpu.pipeline_mode<synchronous>, transform_indices = @transform_3, window_bounds = array<i64: 128, 128>}, {pipeline_mode = #tpu.pipeline_mode<synchronous>, transform_indices = @transform_4, window_bounds = array<i64: 1, 128>}, {pipeline_mode = #tpu.pipeline_mode<synchronous>, transform_indices = @transform_5, window_bounds = array<i64: 128, 16>}, {pipeline_mode = #tpu.pipeline_mode<synchronous>, transform_indices = @transform_6, window_bounds = array<i64: 1, 16>}, {transform_indices = @transform_7, window_bounds = array<i64: 32, 16>}]} {
    %c0 = arith.constant 0 : index
    %c0_0 = arith.constant 0 : index
    %0 = vector.load %arg1[%c0, %c0_0] : memref<32x32xf32, #tpu.memory_space<vmem>>, vector<32x32xf32>
    %1 = arith.truncf %0 : vector<32x32xf32> to vector<32x32xbf16>
    %c0_1 = arith.constant 0 : index
    %c0_2 = arith.constant 0 : index
    %2 = vector.load %arg2[%c0_1, %c0_2] : memref<32x128xbf16, #tpu.memory_space<vmem>>, vector<32x128xbf16>
    %cst = arith.constant dense<0.000000e+00> : vector<32x128xf32>
    %3 = tpu.matmul %1, %2, %cst {dimension_numbers = #tpu.dot_dimension_numbers<[1], [0], [0], [1], [0, 0, 1, 1], [], []>} : vector<32x32xbf16>, vector<32x128xbf16>, vector<32x128xf32> -> vector<32x128xf32>
    %c0_3 = arith.constant 0 : index
    %c0_4 = arith.constant 0 : index
    %4 = vector.load %arg3[%c0_3, %c0_4] : memref<1x128xf32, #tpu.memory_space<vmem>>, vector<1x128xf32>
    %5 = vector.broadcast %4 : vector<1x128xf32> to vector<32x128xf32>
    %6 = arith.addf %3, %5 : vector<32x128xf32>
    %cst_5 = arith.constant 0.000000e+00 : f32
    %7 = vector.broadcast %cst_5 : f32 to vector<32x128xf32>
    %8 = arith.maximumf %6, %7 : vector<32x128xf32>
    %9 = arith.truncf %8 : vector<32x128xf32> to vector<32x128xbf16>
    %c0_6 = arith.constant 0 : index
    %c0_7 = arith.constant 0 : index
    %10 = vector.load %arg4[%c0_6, %c0_7] : memref<128x128xbf16, #tpu.memory_space<vmem>>, vector<128x128xbf16>
    %cst_8 = arith.constant dense<0.000000e+00> : vector<32x128xf32>
    %11 = tpu.matmul %9, %10, %cst_8 {dimension_numbers = #tpu.dot_dimension_numbers<[1], [0], [0], [1], [0, 0, 1, 1], [], []>} : vector<32x128xbf16>, vector<128x128xbf16>, vector<32x128xf32> -> vector<32x128xf32>
    %c0_9 = arith.constant 0 : index
    %c0_10 = arith.constant 0 : index
    %12 = vector.load %arg5[%c0_9, %c0_10] : memref<1x128xf32, #tpu.memory_space<vmem>>, vector<1x128xf32>
    %13 = vector.broadcast %12 : vector<1x128xf32> to vector<32x128xf32>
    %14 = arith.addf %11, %13 : vector<32x128xf32>
    %15 = arith.truncf %14 : vector<32x128xf32> to vector<32x128xbf16>
    %16 = math.tanh %15 : vector<32x128xbf16>
    %c0_11 = arith.constant 0 : index
    %c0_12 = arith.constant 0 : index
    %17 = vector.load %arg6[%c0_11, %c0_12] : memref<128x16xbf16, #tpu.memory_space<vmem>>, vector<128x16xbf16>
    %cst_13 = arith.constant dense<0.000000e+00> : vector<32x16xf32>
    %18 = tpu.matmul %16, %17, %cst_13 {dimension_numbers = #tpu.dot_dimension_numbers<[1], [0], [0], [1], [0, 0, 1, 1], [], []>} : vector<32x128xbf16>, vector<128x16xbf16>, vector<32x16xf32> -> vector<32x16xf32>
    %c0_14 = arith.constant 0 : index
    %c0_15 = arith.constant 0 : index
    %19 = vector.load %arg7[%c0_14, %c0_15] : memref<1x16xf32, #tpu.memory_space<vmem>>, vector<1x16xf32>
    %20 = vector.broadcast %19 : vector<1x16xf32> to vector<32x16xf32>
    %21 = arith.addf %18, %20 : vector<32x16xf32>
    %cst_16 = arith.constant dense<0xFF800000> : vector<32xf32>
    %22 = vector.multi_reduction <maximumf>, %21, %cst_16 [1] : vector<32x16xf32> to vector<32xf32>
    %23 = vector.shape_cast %22 : vector<32xf32> to vector<32x1xf32>
    %24 = vector.broadcast %23 : vector<32x1xf32> to vector<32x16xf32>
    %25 = arith.subf %21, %24 : vector<32x16xf32>
    %26 = math.exp %25 : vector<32x16xf32>
    %cst_17 = arith.constant dense<0.000000e+00> : vector<32xf32>
    %27 = vector.multi_reduction <add>, %26, %cst_17 [1] : vector<32x16xf32> to vector<32xf32>
    %28 = vector.shape_cast %27 : vector<32xf32> to vector<32x1xf32>
    %29 = vector.broadcast %28 : vector<32x1xf32> to vector<32x16xf32>
    %30 = arith.divf %26, %29 : vector<32x16xf32>
    %c0_18 = arith.constant 0 : index
    %c0_19 = arith.constant 0 : index
    %31 = vector.load %arg8[%c0_18, %c0_19] : memref<32x16xf32, #tpu.memory_space<vmem>>, vector<32x16xf32>
    tpu.vector_store %arg8[%c0_18, %c0_19], %30 {strides = array<i32>} : memref<32x16xf32, #tpu.memory_space<vmem>>, vector<32x16xf32>,
    return
  }
  func.func @transform_0(%arg0: i32) -> (i32, i32) {
    %c0_i32 = arith.constant 0 : i32
    %c0_i32_0 = arith.constant 0 : i32
    return %arg0, %c0_i32 : i32, i32
  }
  func.func @transform_1(%arg0: i32) -> (i32, i32) {
    %c0_i32 = arith.constant 0 : i32
    %c0_i32_0 = arith.constant 0 : i32
    %c0_i32_1 = arith.constant 0 : i32
    return %c0_i32, %c0_i32_0 : i32, i32
  }
  func.func @transform_2(%arg0: i32) -> (i32, i32) {
    %c0_i32 = arith.constant 0 : i32
    %c0_i32_0 = arith.constant 0 : i32
    %c0_i32_1 = arith.constant 0 : i32
    return %c0_i32, %c0_i32_0 : i32, i32
  }
  func.func @transform_3(%arg0: i32) -> (i32, i32) {
    %c0_i32 = arith.constant 0 : i32
    %c0_i32_0 = arith.constant 0 : i32
    %c0_i32_1 = arith.constant 0 : i32
    return %c0_i32, %c0_i32_0 : i32, i32
  }
  func.func @transform_4(%arg0: i32) -> (i32, i32) {
    %c0_i32 = arith.constant 0 : i32
    %c0_i32_0 = arith.constant 0 : i32
    %c0_i32_1 = arith.constant 0 : i32
    return %c0_i32, %c0_i32_0 : i32, i32
  }
  func.func @transform_5(%arg0: i32) -> (i32, i32) {
    %c0_i32 = arith.constant 0 : i32
    %c0_i32_0 = arith.constant 0 : i32
    %c0_i32_1 = arith.constant 0 : i32
    return %c0_i32, %c0_i32_0 : i32, i32
  }
  func.func @transform_6(%arg0: i32) -> (i32, i32) {
    %c0_i32 = arith.constant 0 : i32
    %c0_i32_0 = arith.constant 0 : i32
    %c0_i32_1 = arith.constant 0 : i32
    return %c0_i32, %c0_i32_0 : i32, i32
  }
  func.func @transform_7(%arg0: i32) -> (i32, i32) {
    %c0_i32 = arith.constant 0 : i32
    %c0_i32_0 = arith.constant 0 : i32
    return %arg0, %c0_i32 : i32, i32
  }
}

</mosaic_0001>

<bundles_post_ra>
// kernel: tpu_custom_call.1
= control target key start
LH: loop header
LB: loop body
LE: loop exit
PB: predicated region body
PF: predicated region fallthrough
CT: control target
= control target key end

     0   :  { %s886_s24 = smov 0   ;;  %s999_s0 = inlined_call_operand.vmem [shape: f32[64,32], index: 0, kind: input, shape index: {}]   ;;  %s1000_s1 = inlined_call_operand.vmem [shape: bf16[32,128], index: 1, kind: input, shape index: {}]   ;;  %s1001_s2 = inlined_call_operand.vmem [shape: f32[1,128], index: 2, kind: input, shape index: {}]   ;;  %s1002_s3 = inlined_call_operand.vmem [shape: bf16[128,128], index: 3, kind: input, shape index: {}]   ;;  %s1003_s4 = inlined_call_operand.vmem [shape: f32[1,128], index: 4, kind: input, shape index: {}]   ;;  %s1004_s5 = inlined_call_operand.vmem [shape: bf16[128,16], index: 5, kind: input, shape index: {}]   ;;  %s1005_s6 = inlined_call_operand.vmem [shape: f32[1,16], index: 6, kind: input, shape index: {}]   ;;  %s1006_s7 = inlined_call_operand.vmem [shape: f32[64,16], index: 7, kind: output, shape index: {}]  }
   0x1 LB: > { %s684_s25 = sadd.s32 4294967295, %s844_s24   ;;  %p688_p0 = scmp.ge.s32.totalorder %s844_s24, 1  ;;  %s844_s24 = sphi %s886_s24, %s17_s24  }
   0x2   : > { %p238_p1 = scmp.lt.s32.totalorder %s844_s24, 3 }
   0x4   : > { %p239_p2 = pnand %p688_p0, %p238_p1 }
   0x5   : > { %s689_s28 = sshll.u32 (!%p239_p2), %s684_s25, 2 }
   0x6   : > { %242 = sbr.rel (%p239_p2) target bundleno = 738 (0x2e2), region = 48  ;;  %p271_p3 = scmp.lt.s32.totalorder (!%p239_p2), %s689_s28, 7 }
   0xb   : > { %v770_v0 = vld [vmem:[%s1000_s1 + $0x8] sm:$0xff]  ;;  %v778_v1 = vld [vmem:[%s1002_s3 + $0x38] sm:$0xff]  ;;  %v769_v2 = vld [vmem:[%s1000_s1] sm:$0xff]  ;;  %s1008_s28 = smov (!%p271_p3, %s689_s28), 7  ;;  %vm309_vm0 = vcmask 261120   ;;  %vm527_vm1 = vcmask 130048  }
   0xc   : > { %322 = vmatpush.bf16.msra.mxu0 %v770_v0  ;;  %409 = vmatpush.bf16.msra.mxu1 %v778_v1  ;;  %v777_v3 = vld [vmem:[%s1002_s3 + $0x30] sm:$0xff]  ;;  %s690_s12 = sshll.u32 %s1008_s28, 3  ;;  %v776_v4 = vld [vmem:[%s1002_s3 + $0x28] sm:$0xff]  ;;  %v775_v8 = vld [vmem:[%s1002_s3 + $0x20] sm:$0xff] }
   0xd   : > { %787 = vmatpush.bf16.msra.mxu3 %v778_v1  ;;  %s274_s15 = scalar_lea.vmem %s999_s0, %s690_s12  ;;  %v774_v12 = vld [vmem:[%s1002_s3 + $0x18] sm:$0xff]  ;;  %v773_v13 = vld [vmem:[%s1002_s3 + $0x10] sm:$0xff]  ;;  %v772_v14 = vld [vmem:[%s1002_s3 + $0x8] sm:$0xff]  ;;  %s984_s11 = scalar_lea.vmem %s1006_s7, %s690_s12 }
   0xe   : > { %v283_v5 = vld [vmem:[%s274_s15] sm:$0xff]  ;;  %v284_v6 = vld [vmem:[%s274_s15 + $0x8] sm:$0xff]  ;;  %v285_v9 = vld [vmem:[%s274_s15 + $0x10] sm:$0xff] }
   0xf   : > { %v287_v7 = vpack.c.bf16 %v284_v6, %v283_v5  ;;  %v286_v10 = vld [vmem:[%s274_s15 + $0x18] sm:$0xff]  ;;  %v771_v15 = vld [vmem:[%s1002_s3] sm:$0xff]  ;;  %v785_v18 = vld [vmem:[%s1004_s5 + $0x30] sm:$0xff] }
  0x10   : > { %323 = vmatpush.bf16.msra.mxu0 %v769_v2  ;;  %410 = vmatpush.bf16.msra.mxu1 %v777_v3  ;;  %v288_v11 = vpack.c.bf16 %v286_v10, %v285_v9  ;;  %v786_v16 = vld [vmem:[%s1004_s5 + $0x38] sm:$0xff]  ;;  %v811_v19 = vld [vmem:[%s1001_s2] ss:$0 sm:$0xff]  ;;  %v784_v33 = vld [vmem:[%s1004_s5 + $0x28] sm:$0xff] }
  0x11   : > { %788 = vmatpush.bf16.msra.mxu3 %v777_v3  ;;  %795 = vmatpush.bf16.msra.mxu2 %v786_v16  ;;  %v783_v34 = vld [vmem:[%s1004_s5 + $0x20] sm:$0xff]  ;;  %v782_v35 = vld [vmem:[%s1004_s5 + $0x18] sm:$0xff]  ;;  %v781_v36 = vld [vmem:[%s1004_s5 + $0x10] sm:$0xff] }
  0x12   : > { %v780_v37 = vld [vmem:[%s1004_s5 + $0x8] sm:$0xff]  ;;  %v779_v38 = vld [vmem:[%s1004_s5] sm:$0xff] }
  0x13   : > { %701 = vmatmul.msk.bf16.vlgmr.msra.gmra.mxu0 %vm309_vm0, %v287_v7  ;;  %v812_v40 = vld [vmem:[%s1003_s4] ss:$0 sm:$0xff] }
  0x14   : > { %411 = vmatpush.bf16.msra.mxu1 %v776_v4  ;;  %508 = vmatpush.bf16.msrb.mxu0 %v786_v16  ;;  %v813_v60 = vld [vmem:[%s1005_s6] ss:$0 sm:$0xff] }
  0x15   : > { %789 = vmatpush.bf16.msra.mxu3 %v776_v4  ;;  %796 = vmatpush.bf16.msra.mxu2 %v785_v18 }
  0x18   : > { %412 = vmatpush.bf16.msra.mxu1 %v775_v8  ;;  %509 = vmatpush.bf16.msrb.mxu0 %v785_v18 }
  0x19   : > { %790 = vmatpush.bf16.msra.mxu3 %v775_v8  ;;  %797 = vmatpush.bf16.msra.mxu2 %v784_v33 }
  0x1c   : > { %413 = vmatpush.bf16.msra.mxu1 %v774_v12  ;;  %510 = vmatpush.bf16.msrb.mxu0 %v784_v33 }
  0x1d   : > { %791 = vmatpush.bf16.msra.mxu3 %v774_v12  ;;  %798 = vmatpush.bf16.msra.mxu2 %v783_v34 }
  0x20   : > { %414 = vmatpush.bf16.msra.mxu1 %v773_v13  ;;  %511 = vmatpush.bf16.msrb.mxu0 %v783_v34 }
  0x21   : > { %792 = vmatpush.bf16.msra.mxu3 %v773_v13  ;;  %799 = vmatpush.bf16.msra.mxu2 %v782_v35 }
  0x23   : > { %702 = vmatmul.msk.bf16.gmra.mxu0 %vm309_vm0, %v288_v11 }
  0x24   : > { %415 = vmatpush.bf16.msra.mxu1 %v772_v14  ;;  %512 = vmatpush.bf16.msrb.mxu0 %v782_v35 }
  0x25   : > { %793 = vmatpush.bf16.msra.mxu3 %v772_v14  ;;  %800 = vmatpush.bf16.msra.mxu2 %v781_v36 }
  0x28   : > { %416 = vmatpush.bf16.msra.mxu1 %v771_v15  ;;  %513 = vmatpush.bf16.msrb.mxu0 %v781_v36 }
  0x29   : > { %794 = vmatpush.bf16.msra.mxu3 %v771_v15  ;;  %801 = vmatpush.bf16.msra.mxu2 %v780_v37 }
  0x2c   : > { %514 = vmatpush.bf16.msrb.mxu0 %v780_v37 }
  0x2d   : > { %802 = vmatpush.bf16.msra.mxu2 %v779_v38 }
  0x30   : > { %515 = vmatpush.bf16.msrb.mxu0 %v779_v38 }
  0x90   : > { %v325_v17 = vpop.f32.mrf.mxu0 }
  0x91   : > { %v326_v20 = vadd.f32 %v811_v19, %v325_v17 }
  0x93   : > { %v335_v23 = vmax.f32 %v326_v20, 0.0 }
  0x98   : > { %v327_v21 = vpop.f32.mrf.mxu0 }
  0x99   : > { %v328_v22 = vadd.f32 %v811_v19, %v327_v21 }
  0x9b   : > { %v336_v24 = vmax.f32 %v328_v22, 0.0 }
  0x9d   : > { %v339_v25 = vpack.c.bf16 %v336_v24, %v335_v23 }
  0x9f   : > { %417 = vmatmul.bf16.vlgmr.msra.gmra.mxu1 %v339_v25 }
  0xa0   : > { %v330_v26 = vpop.f32.mrf.mxu0 }
  0xa1   : > { %v331_v27 = vadd.f32 %v811_v19, %v330_v26 }
  0xa3   : > { %v337_v30 = vmax.f32 %v331_v27, 0.0 }
  0xa8   : > { %v332_v28 = vpop.f32.mrf.mxu0 }
  0xa9   : > { %v333_v29 = vadd.f32 %v811_v19, %v332_v28 }
  0xab   : > { %v338_v31 = vmax.f32 %v333_v29, 0.0 }
  0xad   : > { %v340_v32 = vpack.c.bf16 %v338_v31, %v337_v30 }
  0xaf   : > { %422 = vmatmul.bf16.vlgmr.msra.gmra.mxu3 %v340_v32 }
 0x11c   : > { %v418_v39 = vpop.f32.mrf.mxu1 }
 0x11d   : > { %v419_v42 = vadd.f32 %v812_v40, %v418_v39 }
 0x124   : > { %v420_v41 = vpop.f32.mrf.mxu1 }
 0x125   : > { %v421_v43 = vadd.f32 %v812_v40, %v420_v41 }
 0x127   : > { %v428_v44 = vpack.c.bf16 %v421_v43, %v419_v42 }
 0x129   : > { %v430_v45 = vunpack.c.l.bf16 %v428_v44  ;;  %v431_v46 = vunpack.c.h.bf16 %v428_v44 }
 0x12b   : > { %814 = vtanh.f32 %v430_v45 }
 0x12c   : > { %816 = vtanh.f32 %v431_v46 }
 0x131   : > { %v815_v47 = vpop.eup %814 }
 0x132   : > { %v817_v48 = vpop.eup %816  ;;  %v423_v49 = vpop.f32.mrf.mxu3 }
 0x133   : > { %v438_v50 = vpack.c.bf16 %v817_v48, %v815_v47  ;;  %v424_v52 = vadd.f32 %v812_v40, %v423_v49 }
 0x135   : > { %516 = vmatmul.bf16.vlgmr.msrb.gmra.mxu0 %v438_v50 }
 0x13a   : > { %v425_v51 = vpop.f32.mrf.mxu3 }
 0x13b   : > { %v426_v53 = vadd.f32 %v812_v40, %v425_v51 }
 0x13d   : > { %v429_v54 = vpack.c.bf16 %v426_v53, %v424_v52 }
 0x13f   : > { %v432_v55 = vunpack.c.l.bf16 %v429_v54  ;;  %v433_v56 = vunpack.c.h.bf16 %v429_v54 }
 0x141   : > { %818 = vtanh.f32 %v432_v55 }
 0x142   : > { %820 = vtanh.f32 %v433_v56 }
 0x147   : > { %v819_v57 = vpop.eup %818 }
 0x148   : > { %v821_v58 = vpop.eup %820 }
 0x149   : > { %v439_v59 = vpack.c.bf16 %v821_v58, %v819_v57 }
 0x14b   : > { %521 = vmatmul.bf16.vlgmr.msra.gmra.mxu2 %v439_v59 }
 0x1b2   : > { %v517_v61 = vpop.f32.mrf.mxu0 }
 0x1b3   : > { %v518_v62 = vadd.f32 %v813_v60, %v517_v61 }
 0x1b5   : > { %v528_v63 = vsel %vm527_vm1, %v518_v62, -inf }
 0x1b6   : > { %529 = vmax.xlane.f32.xlu0 %v528_v63 }
 0x1ba   : > { %v519_v0 = vpop.f32.mrf.mxu0 }
 0x1bb   : > { %v520_v1 = vadd.f32 %v813_v60, %v519_v0 }
 0x1bd   : > { %v531_v2 = vsel %vm527_vm1, %v520_v1, -inf }
 0x1be   : > { %532 = vmax.xlane.f32.xlu0 %v531_v2 }
 0x1ce   : > { %v522_v3 = vpop.f32.mrf.mxu2 }
 0x1cf   : > { %v523_v4 = vadd.f32 %v813_v60, %v522_v3 }
 0x1d1   : > { %v534_v5 = vsel %vm527_vm1, %v523_v4, -inf }
 0x1d2   : > { %535 = vmax.xlane.f32.xlu1 %v534_v5 }
 0x1d6   : > { %v524_v6 = vpop.f32.mrf.mxu2 }
 0x1d7   : > { %v525_v7 = vadd.f32 %v813_v60, %v524_v6 }
 0x1d9   : > { %v537_v8 = vsel %vm527_vm1, %v525_v7, -inf }
 0x1da   : > { %538 = vmax.xlane.f32.xlu1 %v537_v8 }
 0x229   : > { %v530_v9 = vpop.xlane.xlu0 %529 }
 0x22a   : > { %v540_v10 = vsub.f32 %v518_v62, %v530_v9 }
 0x22c   : > { %v544_v11 = vmul.f32 1.442695, %v540_v10 }
 0x22e   : > { %822 = vpow2.f32 %v544_v11 }
 0x231   : > { %v533_v12 = vpop.xlane.xlu0 %532 }
 0x232   : > { %v541_v13 = vsub.f32 %v520_v1, %v533_v12 }
 0x234   : > { %v823_v14 = vpop.eup %822  ;;  %v546_v15 = vmul.f32 1.442695, %v541_v13 }
 0x235   : > { %v552_v16 = vsel %vm527_vm1, %v823_v14, 0.0 }
 0x236   : > { %824 = vpow2.f32 %v546_v15  ;;  %553 = vadd.xlane.f32.xlu2 %v552_v16 }
 0x23c   : > { %v825_v17 = vpop.eup %824 }
 0x23d   : > { %v555_v18 = vsel %vm527_vm1, %v825_v17, 0.0 }
 0x23e   : > { %556 = vadd.xlane.f32.xlu2 %v555_v18 }
 0x245   : > { %v536_v19 = vpop.xlane.xlu1 %535 }
 0x246   : > { %v542_v20 = vsub.f32 %v523_v4, %v536_v19 }
 0x248   : > { %v548_v21 = vmul.f32 1.442695, %v542_v20 }
 0x24a   : > { %826 = vpow2.f32 %v548_v21 }
 0x24d   : > { %v539_v22 = vpop.xlane.xlu1 %538 }
 0x24e   : > { %v543_v23 = vsub.f32 %v525_v7, %v539_v22 }
 0x250   : > { %v971_v24 = vpop.eup %826  ;;  %v550_v25 = vmul.f32 1.442695, %v543_v23 }
 0x251   : > { %v558_v26 = vsel %vm527_vm1, %v971_v24, 0.0 }
 0x252   : > { %828 = vpow2.f32 %v550_v25  ;;  %559 = vadd.xlane.f32.xlu0 %v558_v26 }
 0x258   : > { %v975_v27 = vpop.eup %828 }
 0x259   : > { %v561_v28 = vsel %vm527_vm1, %v975_v27, 0.0 }
 0x25a   : > { %562 = vadd.xlane.f32.xlu1 %v561_v28 }
 0x2a9   : > { %v554_v29 = vpop.xlane.xlu2 %553 }
 0x2aa   : > { %830 = vrcp.f32 %v554_v29  ;;  %v575_v34 = vand.u32 2147483648, %v554_v29  ;;  %v573_v36 = vand.u32 2147483647, %v554_v29  ;;  %vm569_vm3 = vweird.f32 %v554_v29 }
 0x2ac   : > { %v576_v39 = vor.u32 1.1754944e-38, %v575_v34  ;;  %vm574_vm5 = vcmp.eq.f32.partialorder %v573_v36, 8.507059e+37 }
 0x2b0   : > { %v831_v30 = vpop.eup %830 }
 0x2b1   : > { %v565_v31 = vmul.f32 %v831_v30, %v554_v29  ;;  %v557_v32 = vpop.xlane.xlu2 %556  ;;  %vm570_vm2 = vweird.f32 %v831_v30 }
 0x2b2   : > { %832 = vrcp.f32 %v557_v32  ;;  %vm571_vm4 = vmor %vm569_vm3, %vm570_vm2  ;;  %v590_v45 = vand.u32 2147483648, %v557_v32  ;;  %v588_v47 = vand.u32 2147483647, %v557_v32  ;;  %vm584_vm7 = vweird.f32 %v557_v32 }
 0x2b3   : > { %v566_v33 = vsub.f32 1.0, %v565_v31 }
 0x2b4   : > { %v591_v49 = vor.u32 1.1754944e-38, %v590_v45  ;;  %vm589_vm9 = vcmp.eq.f32.partialorder %v588_v47, 8.507059e+37 }
 0x2b5   : > { %v567_v35 = vmul.f32 %v831_v30, %v566_v33 }
 0x2b7   : > { %v568_v37 = vadd.f32 %v831_v30, %v567_v35 }
 0x2b8   : > { %v833_v38 = vpop.eup %832 }
 0x2b9   : > { %v572_v40 = vsel %vm571_vm4, %v831_v30, %v568_v37  ;;  %v580_v41 = vmul.f32 %v833_v38, %v557_v32  ;;  %vm585_vm6 = vweird.f32 %v833_v38 }
 0x2ba   : > { %v577_v42 = vsel %vm574_vm5, %v576_v39, %v572_v40  ;;  %vm586_vm8 = vmor %vm584_vm7, %vm585_vm6 }
 0x2bb   : > { %v578_v43 = vmul.f32 %v823_v14, %v577_v42  ;;  %v581_v44 = vsub.f32 1.0, %v580_v41 }
 0x2bd   : > { %624 = vst.msk [vmem:[%s984_s11] sm:$0xff] %vm527_vm1, %v578_v43  ;;  %v582_v46 = vmul.f32 %v833_v38, %v581_v44 }
 0x2bf   : > { %v583_v48 = vadd.f32 %v833_v38, %v582_v46 }
 0x2c1   : > { %v587_v50 = vsel %vm586_vm8, %v833_v38, %v583_v48 }
 0x2c2   : > { %v592_v51 = vsel %vm589_vm9, %v591_v49, %v587_v50 }
 0x2c3   : > { %v593_v52 = vmul.f32 %v825_v17, %v592_v51 }
 0x2c5   : > { %625 = vst.msk [vmem:[%s984_s11 + $0x8] sm:$0xff] %vm527_vm1, %v593_v52  ;;  %v560_v53 = vpop.xlane.xlu0 %559 }
 0x2c6   : > { %834 = vrcp.f32 %v560_v53  ;;  %v605_v58 = vand.u32 2147483648, %v560_v53  ;;  %v603_v60 = vand.u32 2147483647, %v560_v53  ;;  %vm599_vm11 = vweird.f32 %v560_v53 }
 0x2c8   : > { %v606_v63 = vor.u32 1.1754944e-38, %v605_v58  ;;  %vm604_vm13 = vcmp.eq.f32.partialorder %v603_v60, 8.507059e+37 }
 0x2cc   : > { %v835_v54 = vpop.eup %834 }
 0x2cd   : > { %v595_v55 = vmul.f32 %v835_v54, %v560_v53  ;;  %v563_v56 = vpop.xlane.xlu1 %562  ;;  %vm600_vm10 = vweird.f32 %v835_v54 }
 0x2ce   : > { %836 = vrcp.f32 %v563_v56  ;;  %vm601_vm12 = vmor %vm599_vm11, %vm600_vm10  ;;  %v620_v5 = vand.u32 2147483648, %v563_v56  ;;  %v618_v7 = vand.u32 2147483647, %v563_v56  ;;  %vm614_vm15 = vweird.f32 %v563_v56 }
 0x2cf   : > { %v596_v57 = vsub.f32 1.0, %v595_v55 }
 0x2d0   : > { %v621_v9 = vor.u32 1.1754944e-38, %v620_v5  ;;  %vm619_vm2 = vcmp.eq.f32.partialorder %v618_v7, 8.507059e+37 }
 0x2d1   : > { %v597_v59 = vmul.f32 %v835_v54, %v596_v57 }
 0x2d3   : > { %v598_v61 = vadd.f32 %v835_v54, %v597_v59 }
 0x2d4   : > { %v837_v62 = vpop.eup %836 }
 0x2d5   : > { %v602_v0 = vsel %vm601_vm12, %v835_v54, %v598_v61  ;;  %v610_v1 = vmul.f32 %v837_v62, %v563_v56  ;;  %vm615_vm14 = vweird.f32 %v837_v62 }
 0x2d6   : > { %v607_v2 = vsel %vm604_vm13, %v606_v63, %v602_v0  ;;  %vm616_vm0 = vmor %vm614_vm15, %vm615_vm14 }
 0x2d7   : > { %v608_v3 = vmul.f32 %v971_v24, %v607_v2  ;;  %v611_v4 = vsub.f32 1.0, %v610_v1 }
 0x2d9   : > { %626 = vst.msk [vmem:[%s984_s11 + $0x10] sm:$0xff] %vm527_vm1, %v608_v3  ;;  %v612_v6 = vmul.f32 %v837_v62, %v611_v4 }
 0x2db   : > { %v613_v8 = vadd.f32 %v837_v62, %v612_v6 }
 0x2dd   : > { %v617_v10 = vsel %vm616_vm0, %v837_v62, %v613_v8 }
 0x2de   : > { %v622_v11 = vsel %vm619_vm2, %v621_v9, %v617_v10 }
 0x2df   : > { %v623_v12 = vmul.f32 %v975_v27, %v622_v11 }
 0x2e1   : > { %627 = vst.msk [vmem:[%s984_s11 + $0x18] sm:$0xff] %vm527_vm1, %v623_v12 }
 0x2e2 PF: > { %s17_s24 = sadd.s32 1, %s844_s24  }
 0x2e3   : > { %p14_p4 = scmp.ge.s32.totalorder %s17_s24, 4  }
 0x2e5   :  { %16 = sbr.rel (!%p14_p4) target bundleno = 1 (0x1), region = 78 }

</bundles_post_ra>
